<compile_context>
chip_gen: v5e
topology: v5e:2x2
jax: 0.10.0
libtpu: 0.0.40
codegen_flags: <defaults>
</compile_context>

<pallas_src>
import math

import jax
import jax.numpy as jnp
from jax.experimental import pallas as pl
from jax.experimental.pallas import tpu as pltpu


def _conv_bn_lrelu_kernel(x_ref, w_ref, scale_ref, shift_ref, o_ref):
    # x_ref:     (1, 1, TH+2, (W+2)*Cin)   bf16 row-slab input tile (halo included)
    # w_ref:     (3, (W+2)*Cin, W*Cout_p)  bf16 banded (Toeplitz-in-W) conv weights
    # scale_ref: (1, W*Cout_p)             f32 folded BN scale, tiled W times
    # shift_ref: (1, W*Cout_p)             f32 folded BN shift, tiled W times
    # o_ref:     (1, 1, TH, W*Cout_p)
    th = o_ref.shape[2]
    x = x_ref[0, 0]                                    # (TH+2, (W+2)*Cin)

    # 3x3 conv == 3 fat matmuls (one per kh tap); the kw taps are folded into the
    # banded weight matrix's K dim, so each LHS is just a sublane row-slice.
    acc = jnp.dot(x[0:th], w_ref[0], preferred_element_type=jnp.float32)
    acc = acc + jnp.dot(x[1:th + 1], w_ref[1], preferred_element_type=jnp.float32)
    acc = acc + jnp.dot(x[2:th + 2], w_ref[2], preferred_element_type=jnp.float32)

    # Fused folded BatchNorm + LeakyReLU(0.01) in f32, cast on the final store.
    y = acc * scale_ref[0][None, :] + shift_ref[0][None, :]
    y = jnp.where(y >= 0, y, 0.01 * y)
    o_ref[0, 0] = y.astype(o_ref.dtype)


def _pick_row_tile(h, target):
    th = min(target, h)
    while h % th != 0:
        th -= 1
    return th


def _build_banded_weights(weight_oihw, w_len, cout_p, dtype):
    """(Cout, Cin, 3, 3) -> (3, (W+2)*Cin, W*Cout_p), absorbing the kw shifts."""
    cout, cin, n_kh, n_kw = weight_oihw.shape
    w_hwio = jnp.transpose(weight_oihw, (2, 3, 1, 0)).astype(jnp.float32)
    w_hwio = jnp.pad(w_hwio, ((0, 0), (0, 0), (0, 0), (0, cout_p - cout)))
    band = jnp.zeros((n_kh, (w_len + 2) * cin, w_len * cout_p), jnp.float32)
    for k in range(n_kw):
        # sel[w_in, w_out] = 1  iff  w_in == w_out + k
        sel = jnp.eye(w_len + 2, w_len, k=-k, dtype=jnp.float32)
        band = band + jnp.einsum('io,hcd->hicod', sel, w_hwio[:, k]).reshape(
            n_kh, (w_len + 2) * cin, w_len * cout_p)
    return band.astype(dtype)


def conv_bn_relu(x_nchw, weight_oihw, gamma, beta, running_mean, running_var,
                 eps=1e-5, row_tile=8, mxu_dtype=jnp.bfloat16):
    """x_nchw: (N, Cin, H, W); weight_oihw: (Cout, Cin, 3, 3). Returns (N, Cout, H, W)."""
    n, cin, h, w = x_nchw.shape
    cout = weight_oihw.shape[0]

    # Pad Cout so the flattened output lane dim (W * Cout_p) is a multiple of 128.
    lane_unit = 128 // math.gcd(w, 128)
    cout_p = ((cout + lane_unit - 1) // lane_unit) * lane_unit

    th = _pick_row_tile(h, row_tile)
    n_tiles = h // th
    wc_in = (w + 2) * cin
    wc_out = w * cout_p

    # --- wrapper glue (plain JAX): layout, halo pre-split, BN folding ----------
    x_nhwc = jnp.transpose(x_nchw, (0, 2, 3, 1))                  # (N, H, W, Cin)
    x_pad = jnp.pad(x_nhwc, ((0, 0), (1, 1), (1, 1), (0, 0)))     # (N, H+2, W+2, Cin)
    x_flat = x_pad.reshape(n, h + 2, wc_in)
    # Overlapping (TH+2)-row tiles so every Pallas block is non-overlapping.
    x_tiles = jnp.stack(
        [x_flat[:, t * th:t * th + th + 2] for t in range(n_tiles)],
        axis=1).astype(mxu_dtype)                                 # (N, nT, TH+2, (W+2)*Cin)

    band_w = _build_banded_weights(weight_oihw, w, cout_p, mxu_dtype)

    inv_std = gamma / jnp.sqrt(running_var + eps)
    scale_p = jnp.pad(inv_std.astype(jnp.float32), (0, cout_p - cout))
    shift_p = jnp.pad((beta - running_mean * inv_std).astype(jnp.float32),
                      (0, cout_p - cout))
    scale_row = jnp.tile(scale_p, w).reshape(1, wc_out)
    shift_row = jnp.tile(shift_p, w).reshape(1, wc_out)

    out_tiles = pl.pallas_call(
        _conv_bn_lrelu_kernel,
        out_shape=jax.ShapeDtypeStruct((n, n_tiles, th, wc_out), x_nchw.dtype),
        grid_spec=pltpu.PrefetchScalarGridSpec(
            num_scalar_prefetch=0,
            grid=(n, n_tiles),
            in_specs=[
                pl.BlockSpec((1, 1, th + 2, wc_in), lambda i, t: (i, t, 0, 0)),
                pl.BlockSpec((3, wc_in, wc_out), lambda i, t: (0, 0, 0)),
                pl.BlockSpec((1, wc_out), lambda i, t: (0, 0)),
                pl.BlockSpec((1, wc_out), lambda i, t: (0, 0)),
            ],
            out_specs=pl.BlockSpec((1, 1, th, wc_out), lambda i, t: (i, t, 0, 0)),
        ),
        compiler_params=pltpu.CompilerParams(
            dimension_semantics=("parallel", "parallel"),
            vmem_limit_bytes=48 * 1024 * 1024),
    )(x_tiles, band_w, scale_row, shift_row)

    out_nhwc = out_tiles.reshape(n, h, w, cout_p)[..., :cout]
    return jnp.transpose(out_nhwc, (0, 3, 1, 2))                  # back to NCHW


def _reference(x_nchw, weight_oihw, gamma, beta, running_mean, running_var,
               eps=1e-5):
    y = jax.lax.conv_general_dilated(
        x_nchw, weight_oihw, window_strides=(1, 1), padding=((1, 1), (1, 1)),
        dimension_numbers=("NCHW", "OIHW", "NCHW"))
    scale = gamma / jnp.sqrt(running_var + eps)
    shift = beta - running_mean * scale
    y = y * scale[None, :, None, None] + shift[None, :, None, None]
    return jnp.where(y >= 0, y, 0.01 * y)


if __name__ == "__main__":
    key = jax.random.PRNGKey(0)
    k_x, k_w, k_g, k_b, k_m, k_v = jax.random.split(key, 6)

    N, Cin, Cout, H, W = 2, 4, 8, 16, 16
    x = jax.random.normal(k_x, (N, Cin, H, W), dtype=jnp.float32)
    weight = jax.random.normal(k_w, (Cout, Cin, 3, 3), dtype=jnp.float32) * 0.1
    gamma = jax.random.normal(k_g, (Cout,), dtype=jnp.float32) * 0.1 + 1.0
    beta = jax.random.normal(k_b, (Cout,), dtype=jnp.float32) * 0.1
    running_mean = jax.random.normal(k_m, (Cout,), dtype=jnp.float32) * 0.1
    running_var = jax.random.uniform(k_v, (Cout,), dtype=jnp.float32,
                                     minval=0.5, maxval=1.5)

    out = conv_bn_relu(x, weight, gamma, beta, running_mean, running_var)
    out = jax.block_until_ready(out)

    ref = _reference(x, weight, gamma, beta, running_mean, running_var)
    assert out.shape == (N, Cout, H, W)
    # Tolerance reflects bf16 MXU inputs (f32 accumulation) vs the f32 reference.
    assert jnp.allclose(out, ref, atol=5e-2, rtol=5e-2), "mismatch vs reference"

    print("KERNEL_OK")
</pallas_src>

<mosaic_0001>
module attributes {stable_mosaic.version = 11 : i64} {
  func.func @_conv_bn_lrelu_kernel(%arg0: i32, %arg1: i32, %arg2: memref<1x1x10x72xbf16, #tpu.memory_space<vmem>>, %arg3: memref<3x72x128xbf16, #tpu.memory_space<vmem>>, %arg4: memref<1x128xf32, #tpu.memory_space<vmem>>, %arg5: memref<1x128xf32, #tpu.memory_space<vmem>>, %arg6: memref<1x1x8x128xf32, #tpu.memory_space<vmem>>) attributes {dimension_semantics = [#tpu.dimension_semantics<parallel>, #tpu.dimension_semantics<parallel>], iteration_bounds = array<i64: 2, 2>, scalar_prefetch = 0 : i64, scratch_operands = 0 : i64, tpu.core_type = #tpu.core_type<tc>, window_params = [{transform_indices = @transform_0, window_bounds = array<i64: 1, 1, 10, 72>}, {pipeline_mode = #tpu.pipeline_mode<synchronous>, transform_indices = @transform_1, window_bounds = array<i64: 3, 72, 128>}, {pipeline_mode = #tpu.pipeline_mode<synchronous>, transform_indices = @transform_2, window_bounds = array<i64: 1, 128>}, {pipeline_mode = #tpu.pipeline_mode<synchronous>, transform_indices = @transform_3, window_bounds = array<i64: 1, 128>}, {transform_indices = @transform_4, window_bounds = array<i64: 1, 1, 8, 128>}]} {
    %c0 = arith.constant 0 : index
    %c0_0 = arith.constant 0 : index
    %c0_1 = arith.constant 0 : index
    %c0_2 = arith.constant 0 : index
    %0 = vector.load %arg2[%c0, %c0_0, %c0_1, %c0_2] : memref<1x1x10x72xbf16, #tpu.memory_space<vmem>>, vector<1x1x10x72xbf16>
    %1 = vector.shape_cast %0 : vector<1x1x10x72xbf16> to vector<10x72xbf16>
    %2 = vector.extract_strided_slice %1 {offsets = [0, 0], sizes = [8, 72], strides = [1, 1]} : vector<10x72xbf16> to vector<8x72xbf16>
    %c0_3 = arith.constant 0 : index
    %c0_4 = arith.constant 0 : index
    %c0_5 = arith.constant 0 : index
    %3 = vector.load %arg3[%c0_3, %c0_4, %c0_5] : memref<3x72x128xbf16, #tpu.memory_space<vmem>>, vector<1x72x128xbf16>
    %4 = vector.shape_cast %3 : vector<1x72x128xbf16> to vector<72x128xbf16>
    %cst = arith.constant dense<0.000000e+00> : vector<8x128xf32>
    %5 = tpu.matmul %2, %4, %cst {dimension_numbers = #tpu.dot_dimension_numbers<[1], [0], [0], [1], [0, 0, 1, 1], [], []>} : vector<8x72xbf16>, vector<72x128xbf16>, vector<8x128xf32> -> vector<8x128xf32>
    %6 = vector.extract_strided_slice %1 {offsets = [1, 0], sizes = [8, 72], strides = [1, 1]} : vector<10x72xbf16> to vector<8x72xbf16>
    %c1 = arith.constant 1 : index
    %c0_6 = arith.constant 0 : index
    %c0_7 = arith.constant 0 : index
    %7 = vector.load %arg3[%c1, %c0_6, %c0_7] : memref<3x72x128xbf16, #tpu.memory_space<vmem>>, vector<1x72x128xbf16>
    %8 = vector.shape_cast %7 : vector<1x72x128xbf16> to vector<72x128xbf16>
    %cst_8 = arith.constant dense<0.000000e+00> : vector<8x128xf32>
    %9 = tpu.matmul %6, %8, %cst_8 {dimension_numbers = #tpu.dot_dimension_numbers<[1], [0], [0], [1], [0, 0, 1, 1], [], []>} : vector<8x72xbf16>, vector<72x128xbf16>, vector<8x128xf32> -> vector<8x128xf32>
    %10 = arith.addf %5, %9 : vector<8x128xf32>
    %11 = vector.extract_strided_slice %1 {offsets = [2, 0], sizes = [8, 72], strides = [1, 1]} : vector<10x72xbf16> to vector<8x72xbf16>
    %c2 = arith.constant 2 : index
    %c0_9 = arith.constant 0 : index
    %c0_10 = arith.constant 0 : index
    %12 = vector.load %arg3[%c2, %c0_9, %c0_10] : memref<3x72x128xbf16, #tpu.memory_space<vmem>>, vector<1x72x128xbf16>
    %13 = vector.shape_cast %12 : vector<1x72x128xbf16> to vector<72x128xbf16>
    %cst_11 = arith.constant dense<0.000000e+00> : vector<8x128xf32>
    %14 = tpu.matmul %11, %13, %cst_11 {dimension_numbers = #tpu.dot_dimension_numbers<[1], [0], [0], [1], [0, 0, 1, 1], [], []>} : vector<8x72xbf16>, vector<72x128xbf16>, vector<8x128xf32> -> vector<8x128xf32>
    %15 = arith.addf %10, %14 : vector<8x128xf32>
    %c0_12 = arith.constant 0 : index
    %c0_13 = arith.constant 0 : index
    %16 = vector.load %arg4[%c0_12, %c0_13] : memref<1x128xf32, #tpu.memory_space<vmem>>, vector<1x128xf32>
    %17 = vector.shape_cast %16 : vector<1x128xf32> to vector<128xf32>
    %18 = vector.shape_cast %17 : vector<128xf32> to vector<1x128xf32>
    %19 = vector.broadcast %18 : vector<1x128xf32> to vector<8x128xf32>
    %20 = arith.mulf %15, %19 : vector<8x128xf32>
    %c0_14 = arith.constant 0 : index
    %c0_15 = arith.constant 0 : index
    %21 = vector.load %arg5[%c0_14, %c0_15] : memref<1x128xf32, #tpu.memory_space<vmem>>, vector<1x128xf32>
    %22 = vector.shape_cast %21 : vector<1x128xf32> to vector<128xf32>
    %23 = vector.shape_cast %22 : vector<128xf32> to vector<1x128xf32>
    %24 = vector.broadcast %23 : vector<1x128xf32> to vector<8x128xf32>
    %25 = arith.addf %20, %24 : vector<8x128xf32>
    %cst_16 = arith.constant 0.000000e+00 : f32
    %26 = vector.broadcast %cst_16 : f32 to vector<8x128xf32>
    %27 = arith.cmpf oge, %25, %26 : vector<8x128xf32>
    %cst_17 = arith.constant 0.00999999977 : f32
    %28 = vector.broadcast %cst_17 : f32 to vector<8x128xf32>
    %29 = arith.mulf %28, %25 : vector<8x128xf32>
    %30 = arith.select %27, %25, %29 : vector<8x128xi1>, vector<8x128xf32>
    %c0_18 = arith.constant 0 : index
    %c0_19 = arith.constant 0 : index
    %c0_20 = arith.constant 0 : index
    %c0_21 = arith.constant 0 : index
    %31 = vector.load %arg6[%c0_18, %c0_19, %c0_20, %c0_21] : memref<1x1x8x128xf32, #tpu.memory_space<vmem>>, vector<1x1x8x128xf32>
    %32 = vector.shape_cast %31 : vector<1x1x8x128xf32> to vector<8x128xf32>
    %33 = vector.shape_cast %30 : vector<8x128xf32> to vector<1x1x8x128xf32>
    tpu.vector_store %arg6[%c0_18, %c0_19, %c0_20, %c0_21], %33 {strides = array<i32>} : memref<1x1x8x128xf32, #tpu.memory_space<vmem>>, vector<1x1x8x128xf32>,
    return
  }
  func.func @transform_0(%arg0: i32, %arg1: i32) -> (i32, i32, i32, i32) {
    %c0_i32 = arith.constant 0 : i32
    %c0_i32_0 = arith.constant 0 : i32
    %c0_i32_1 = arith.constant 0 : i32
    return %arg0, %arg1, %c0_i32, %c0_i32_0 : i32, i32, i32, i32
  }
  func.func @transform_1(%arg0: i32, %arg1: i32) -> (i32, i32, i32) {
    %c0_i32 = arith.constant 0 : i32
    %c0_i32_0 = arith.constant 0 : i32
    %c0_i32_1 = arith.constant 0 : i32
    %c0_i32_2 = arith.constant 0 : i32
    return %c0_i32, %c0_i32_0, %c0_i32_1 : i32, i32, i32
  }
  func.func @transform_2(%arg0: i32, %arg1: i32) -> (i32, i32) {
    %c0_i32 = arith.constant 0 : i32
    %c0_i32_0 = arith.constant 0 : i32
    %c0_i32_1 = arith.constant 0 : i32
    return %c0_i32, %c0_i32_0 : i32, i32
  }
  func.func @transform_3(%arg0: i32, %arg1: i32) -> (i32, i32) {
    %c0_i32 = arith.constant 0 : i32
    %c0_i32_0 = arith.constant 0 : i32
    %c0_i32_1 = arith.constant 0 : i32
    return %c0_i32, %c0_i32_0 : i32, i32
  }
  func.func @transform_4(%arg0: i32, %arg1: i32) -> (i32, i32, i32, i32) {
    %c0_i32 = arith.constant 0 : i32
    %c0_i32_0 = arith.constant 0 : i32
    %c0_i32_1 = arith.constant 0 : i32
    return %arg0, %arg1, %c0_i32, %c0_i32_0 : i32, i32, i32, i32
  }
}

</mosaic_0001>

<bundles_post_ra>
// kernel: tpu_custom_call.1
= control target key start
LH: loop header
LB: loop body
LE: loop exit
PB: predicated region body
PF: predicated region fallthrough
CT: control target
= control target key end

     0   :  { %9 = vsyncpa [#allocation3], 0  ;;  %s1034_s0 = inlined_call_operand.vmem [shape: bf16[2,2,10,72], index: 0, kind: input, shape index: {}]   ;;  %s1035_s1 = inlined_call_operand.hbm [shape: bf16[3,72,128], index: 1, kind: input, shape index: {}]   ;;  %s1036_s2 = inlined_call_operand.vmem [shape: f32[1,128], index: 2, kind: input, shape index: {}]   ;;  %s1037_s3 = inlined_call_operand.vmem [shape: f32[1,128], index: 3, kind: input, shape index: {}]   ;;  %s1038_s4 = inlined_call_operand.hbm [shape: f32[2,2,8,128], index: 4, kind: output, shape index: {}]  }
   0x1   :  { %10 = vsyncpa [#allocation4], 0 }
   0x2   :  { %12 = vsyncpa [#allocation4 + $0x1], 0  ;;  %s880_s15 = smov 0   ;;  %s882_s16 = smov 0  }
   0x3   :  { %s884_s17 = smov 0   ;;  %s886_s18 = smov 0  }
   0x4   :  { %s888_s19 = smov 0   ;;  %s890_s20 = smov 0  }
   0x5   :  { %s892_s21 = smov 0   ;;  %s894_s22 = smov 0  }
   0x6 LB: > { %s552_s23 = sadd.s32 4294967295, %s850_s22   ;;  %s553_s24 = sadd.s32 4294967294, %s850_s22   ;;  %s850_s22 = sphi %s894_s22, %s18_s22   ;;  %s846_s21 = sphi %s892_s21, %s1049_s21   ;;  %s842_s20 = sphi %s890_s20, %s1048_s20   ;;  %s838_s19 = sphi %s888_s19, %s1047_s19   ;;  %s834_s18 = sphi %s886_s18, %s1046_s18   ;;  %s830_s17 = sphi %s884_s17, %s1045_s17   ;;  %s826_s16 = sphi %s882_s16, %s1044_s16   ;;  %s822_s15 = sphi %s880_s15, %s1043_s15  }
   0x7   : > { %s27_s25 = sadd.s32 1, %s842_s20  ;;  %s30_s26 = sadd.s32 1, %s846_s21 }
   0x8   : > { %p28_p0 = scmp.ge.s32.totalorder %s27_s25, 2  ;;  %s130_s27 = sadd.s32 1, %s830_s17 }
   0x9   : > { %p140_p1 = scmp.ne.s32.totalorder %s830_s17, %s826_s16  ;;  %p141_p2 = scmp.eq.s32.totalorder %s552_s23, 3 }
   0xa   : > { %s1051_s25 = smov (%p28_p0, %s27_s25), 0  ;;  %s1053_s26 = smov (!%p28_p0, %s30_s26), %s846_s21 }
   0xb   : > { %s126_s28 = ssub.s32 %s842_s20, %s1051_s25  ;;  %p932_p3 = por %p141_p2, %p140_p1 }
   0xc   : > { %p32_p4 = scmp.ge.s32.totalorder %s1053_s26, 2  ;;  %p146_p5 = scmp.ne.s32.totalorder %s826_s16, %s822_s15 }
   0xd   : > { %p147_p6 = scmp.eq.s32.totalorder %s553_s24, 3  ;;  %p554_p7 = scmp.ge.s32.totalorder %s850_s22, 1 }
   0xe   : > { %s1055_s26 = smov (%p32_p4, %s1053_s26), 0  ;;  %p154_p9 = scmp.lt.s32.totalorder %s850_s22, 5 }
   0xf   : > { %p941_p8 = por %p147_p6, %p146_p5  ;;  %s125_s5 = ssub.s32 %s846_s21, %s1055_s26 }
  0x10   : > { %s127_s6 = sor.u32 %s126_s28, %s125_s5  ;;  %p948_p10 = pnand %p554_p7, %p154_p9 }
  0x11   : > { %p128_p11 = scmp.eq.s32.totalorder %s127_s6, 0  ;;  %p952_p12 = scmp.eq.s32.totalorder %s552_s23, 0 }
  0x12   : > { %p642_p13 = pneg %p948_p10  ;;  %s165_s11 = sshll.u32 %s1035_s1, 4  ;;  %s166_s11 = int_to_ptr.hbm [resolvable:$true] %s165_s11 }
  0x13   : > { %s962_s12 = scalar_select %p128_p11, %s830_s17, %s130_s27  }
  0x14   : > { %s852_s13 = smov [#allocation2]   ;;  %p643_p0 = pnand %p952_p12, %p642_p13 }
  0x15   : > { %s167_s14 = sshll.u32 %s852_s13, 4  ;;  %s853_s24 = smov 64   ;;  %s168_s14 = int_to_ptr.vmem [resolvable:$true] %s167_s14 }
  0x16   : > { %s854_s23 = smov 4   ;;  %201 = sbr.rel (%p948_p10) target bundleno = 198 (0xc6), region = 36 }
  0x17   : > { %645 = dma.hbm_to_vmem [thread:$0]  (!%p643_p0), %s166_s11, 1728, %s168_s14, [#allocation3], %s853_s24, %s853_s24, %s854_s23  }
  0x1b   : > { %813 = dma.done.wait (%p952_p12), [#allocation3], 1728  }
  0x1c   : > { %815 = vsyncadd (%p952_p12), [#allocation3], 4294965568  ;;  %p232_p1 = scmp.lt.s32.totalorder %s838_s19, 1  ;;  %p234_p2 = scmp.lt.s32.totalorder %s834_s18, 1  ;;  %v262_v0 = vld [vmem:[#allocation2 + $0x44] sm:$0xf] }
  0x1d   : > { %v252_v1 = vld [vmem:[#allocation2 + $0x20] sm:$0xf]  ;;  %v378_v2 = vld [vmem:[#allocation2 + $0x68] sm:$0xf]  ;;  %v292_v3 = vunpack.c.l.b16 %v262_v0  ;;  %vm306_vm0 = vcmask 1043456   ;;  %v627_v13 = vld [vmem:[#allocation2 + $0x18] sm:$0xff] }
  0x1e   : > { %s233_s27 = scalar_select %p232_p1, %s838_s19, 1  ;;  %v340_v4 = vunpack.c.l.b16 %v252_v1  ;;  %v397_v5 = vunpack.c.l.b16 %v378_v2  ;;  %v631_v12 = vld [vmem:[#allocation2 + $0x3c] sm:$0xff]  ;;  %v630_v18 = vld [vmem:[#allocation2 + $0x34] sm:$0xff]  ;;  %v629_v22 = vld [vmem:[#allocation2 + $0x2c] sm:$0xff]  ;;  %vm302_vm1 = vcmask 588800  }
  0x1f   : > { %s235_s28 = scalar_select %p234_p2, %s834_s18, 1  ;;  %v297_v6 = vpack.c.b16 %v292_v3, %v292_v3  ;;  %v635_v16 = vld [vmem:[#allocation2 + $0x60] sm:$0xff]  ;;  %v626_v19 = vld [vmem:[#allocation2 + $0x10] sm:$0xff]  ;;  %v634_v20 = vld [vmem:[#allocation2 + $0x58] sm:$0xff] }
  0x20   : > { %s561_s5 = sshll.u32 %s233_s27, 2  ;;  %v345_v7 = vpack.c.b16 %v340_v4, %v340_v4  ;;  %v402_v8 = vpack.c.b16 %v397_v5, %v397_v5  ;;  %v625_v23 = vld [vmem:[#allocation2 + $0x8] sm:$0xff]  ;;  %v633_v24 = vld [vmem:[#allocation2 + $0x50] sm:$0xff]  ;;  %v624_v28 = vld [vmem:[#allocation2] sm:$0xff]  ;;  %s619_s13 = sshll.u32 %s838_s19, 1 }
  0x21   : > { %s560_s6 = sshll.u32 %s235_s28, 1  ;;  %v308_v9 = vsel %vm306_vm0, %v297_v6, 0  ;;  %v628_v27 = vld [vmem:[#allocation2 + $0x24] sm:$0xff]  ;;  %s229_s14 = sand.u32 1, %s826_s16   ;;  %v720_v36 = vld [vmem:[%s1036_s2] ss:$0 sm:$0xff] }
  0x22   : > { %s238_s9 = sadd.s32 %s561_s5, %s560_s6  ;;  %v354_v10 = vsel %vm306_vm0, %v345_v7, 0  ;;  %v411_v11 = vsel %vm306_vm0, %v402_v8, 0  ;;  %313 = vmatpush.bf16.msra.mxu0 %v308_v9  ;;  %v632_v29 = vld [vmem:[#allocation2 + $0x48] sm:$0xff]  ;;  %s452_s24 = sadd.s32 %s834_s18, %s619_s13  ;;  %v721_v39 = vld [vmem:[%s1037_s3] ss:$0 sm:$0xff] }
  0x23   : > { %s562_s7 = sshll.u32 %s238_s9, 2  ;;  %359 = vmatpush.bf16.msra.mxu1 %v354_v10  ;;  %416 = vmatpush.bf16.msra.mxu2 %v411_v11  ;;  %s559_s28 = sshll.u32 %s229_s14, 3 }
  0x24   : > { %s979_s11 = scalar_lea.vmem %s1034_s0, %s562_s7  ;;  %s620_s5 = sshll.u32 %s452_s24, 3 }
  0x25   : > { %v565_v14 = vld [vmem:[%s979_s11] sm:$0xf]  ;;  %v623_v15 = vld [vmem:[%s979_s11] sm:$0x10]  ;;  %s454_s19 = scalar_lea.hbm %s1038_s4, %s620_s5  ;;  %s231_s18 = scalar_lea.vmem [#allocation5], %s559_s28 }
  0x26   : > { %v566_v17 = vor.u32 %v623_v15, %v565_v14  ;;  %314 = vmatpush.bf16.msra.mxu0 %v631_v12  ;;  %v242_v31 = vld [vmem:[%s979_s11] sm:$0xf]  ;;  %s456_s10 = sshll.u32 %s231_s18, 4  ;;  %s458_s11 = sshll.u32 %s454_s19, 4  ;;  %s457_s10 = int_to_ptr.vmem [resolvable:$true] %s456_s10  ;;  %s459_s11 = int_to_ptr.hbm [resolvable:$true] %s458_s11 }
  0x27   : > { %360 = vmatpush.bf16.msra.mxu1 %v627_v13  ;;  %417 = vmatpush.bf16.msra.mxu2 %v635_v16  ;;  %s442_s13 = scalar_lea.sflag [#allocation4], %s229_s14  ;;  %s766_s24 = sshra.s32 %s459_s11, 4  ;;  %s767_s24 = int_to_ptr.hbm [resolvable:$true] %s766_s24 }
  0x28   : > { %v271_v21 = vshll.u32 %v566_v17, 16  ;;  %v269_v25 = vshrl.u32 %v566_v17, 16  ;;  %v379_v32 = vrot.slane %v566_v17, 1  ;;  %s768_s23 = scalar_lea.hbm %s767_s24, 8  ;;  %s772_s28 = scalar_lea.hbm %s1038_s4, 32 }
  0x29   : > { %p769_p4 = scmp.ne.s32.totalorder %s767_s24, %s768_s23  ;;  %p773_p7 = scmp.lt.s32.totalorder %s767_s24, %s1038_s4 }
  0x2a   : > { %315 = vmatpush.bf16.msra.mxu0 %v630_v18  ;;  %v273_v26 = vrot.slane %v271_v21, 1  ;;  %p774_p9 = scmp.lt.s32.totalorder %s772_s28, %s768_s23 }
  0x2b   : > { %361 = vmatpush.bf16.msra.mxu1 %v626_v19  ;;  %418 = vmatpush.bf16.msra.mxu2 %v634_v20  ;;  %p770_p5 = pnand %p769_p4, %p932_p3 }
  0x2c   : > { %v274_v30 = vor.u32 %v273_v26, %v269_v25  ;;  %p775_p10 = por %p774_p9, %p773_p7 }
  0x2d   : > { %p771_p6 = pneg %p770_p5 }
  0x2e   : > { %316 = vmatpush.bf16.msra.mxu0 %v629_v22 }
  0x2f   : > { %362 = vmatpush.bf16.msra.mxu1 %v625_v23  ;;  %419 = vmatpush.bf16.msra.mxu2 %v633_v24  ;;  %p776_p11 = pnand %p775_p10, %p771_p6 }
  0x32   : > { %317 = vmatpush.bf16.msra.mxu0 %v628_v27 }
  0x33   : > { %363 = vmatpush.bf16.msra.mxu1 %v624_v28  ;;  %420 = vmatpush.bf16.msra.mxu2 %v632_v29 }
  0x35   : > { %583 = vmatmul.msk.bf16.vlgmr.msra.gmra.mxu0 %vm302_vm1, %v274_v30 }
  0x36   : > { %600 = vmatmul.msk.bf16.vlgmr.msra.gmra.mxu1 %vm302_vm1, %v242_v31  ;;  %617 = vmatmul.msk.bf16.vlgmr.msra.gmra.mxu2 %vm302_vm1, %v379_v32 }
  0xb2   : > { %v319_v33 = vpop.f32.mrf.mxu0 }
  0xb3   : > { %v365_v34 = vpop.f32.mrf.mxu1 }
  0xb4   : > { %v366_v35 = vadd.f32 %v365_v34, %v319_v33 }
  0xb9   : > { %v422_v37 = vpop.f32.mrf.mxu2 }
  0xba   : > { %v426_v38 = vadd.f32 %v422_v37, %v366_v35  ;;  %v321_v40 = vpop.f32.mrf.mxu0 }
  0xbb   : > { %v367_v41 = vpop.f32.mrf.mxu1 }
  0xbc   : > { %v431_v42 = vmul.f32 %v720_v36, %v426_v38 }
  0xbe   : > { %v436_v43 = vadd.f32 %v721_v39, %v431_v42 }
  0xc0   : > { %vm437_vm2 = vcmp.ge.f32.partialorder %v436_v43, 0.0  ;;  %v438_v44 = vmul.f32 0.01, %v436_v43 }
  0xc1   : > { %v424_v45 = vpop.f32.mrf.mxu2 }
  0xc2   : > { %v439_v46 = vsel %vm437_vm2, %v436_v43, %v438_v44 }
  0xc3   : > { %440 = vst [vmem:[%s231_s18] sm:$0xff] %v439_v46 }
  0xc4   : > { %779 = shalt.err (!%p776_p11)
}
  0xc5   : > { %640 = dma.vmem_to_hbm [thread:$0]  (%p932_p3), %s457_s10, 128, %s459_s11, %s442_s13  }
  0xc6 PF: > { %p652_p12 = scmp.ge.s32.totalorder %s850_s22, 2  ;;  %s470_s14 = sand.u32 1, %s822_s15  }
  0xc7   : > { %s471_s7 = scalar_lea.sflag [#allocation4], %s470_s14 }
  0xc8   : > { %p647_p13 = pnand %p652_p12, %p941_p8 }
  0xca   : > { %p648_p0 = pneg %p647_p13 }
  0xcc   : > { %817 = dma.done.wait (%p648_p0), %s471_s7, 128  }
  0xcd   : > { %819 = vsyncadd (%p648_p0), %s471_s7, 4294967168  ;;  %s18_s22 = sadd.s32 1, %s850_s22   ;;  %s1043_s15 = smov %s826_s16 }
  0xce   : > { %p15_p1 = scmp.ge.s32.totalorder %s18_s22, 6   ;;  %s1044_s16 = smov %s830_s17 }
  0xcf   : > { %s1045_s17 = smov %s962_s12  ;;  %s1046_s18 = smov %s842_s20 }
  0xd0   : > { %s1047_s19 = smov %s846_s21  ;;  %s1048_s20 = smov %s1051_s25 }
  0xd1   : > { %s1049_s21 = smov %s1055_s26  ;;  %17 = sbr.rel (!%p15_p1) target bundleno = 6 (0x6), region = 78 }
  0xd6   :  { %477 = vsyncpa [#allocation3], 1 }
  0xd7   :  { %479 = vsyncpa [#allocation3 + $0x1], 1 }
  0xd8   :  { %480 = vsyncpa [#allocation4], 1 }
  0xd9   :  { %482 = vsyncpa [#allocation4 + $0x1], 1 }

</bundles_post_ra>
